<compile_context>
chip_gen: v5e
topology: v5e:2x2
jax: 0.10.0
libtpu: 0.0.40
codegen_flags: <defaults>
</compile_context>

<pallas_src>
import functools

import jax
import jax.numpy as jnp
from jax.experimental import pallas as pl
from jax.experimental.pallas import tpu as pltpu

_LANE = 128
_SUBLANE = 8
_NEG_BIG = -1.0e30  # padded class lanes: exp(-1e30 - m) underflows to 0


def _round_up(x, m):
    return ((x + m - 1) // m) * m


def _vmem_capacity_bytes():
    # Generation-aware: 128 MiB on v5e/v6e, 64 MiB per TC on v7x. Fall back to
    # the smallest (v7x) figure if the query is unavailable (e.g. interpret).
    try:
        return int(pltpu.get_tpu_info().vmem_capacity_bytes)
    except Exception:
        return 64 * 1024 * 1024


def _vit_kernel(x_ref, w1_ref, b1_ref, w2_ref, b2_ref, o_ref):
    # fc1: (TB, D) @ (D, H) on the MXU with f32 accumulation. Weights arrive
    # already in matmul dtype (pre-cast once in the wrapper); only the small
    # per-tile activation cast happens in-kernel.
    x = x_ref[...].astype(w1_ref.dtype)
    h = jnp.dot(x, w1_ref[...], preferred_element_type=jnp.float32)
    h = jnp.maximum(h + b1_ref[...], 0.0)  # bias + ReLU in f32 on the VPU

    # fc2: (TB, H) @ (H, C_pad). Padded class lanes carry a -1e30 bias, so
    # their exp is 0 and the softmax over the real classes is exact while the
    # output store stays lane-dense (full vst, no masked partial stores).
    logits = jnp.dot(h.astype(w2_ref.dtype), w2_ref[...],
                     preferred_element_type=jnp.float32)
    logits = logits + b2_ref[...]

    # Numerically stable softmax over the lane-dense class axis.
    m = jnp.max(logits, axis=1, keepdims=True)
    e = jnp.exp(logits - m)
    denom = jnp.sum(e, axis=1, keepdims=True)
    # Exact divide (not approx reciprocal): rows must sum to 1.
    o_ref[...] = (e / denom).astype(o_ref.dtype)


@functools.partial(jax.jit, static_argnames=("block_b", "matmul_dtype"))
def simple_vit_forward(x, w1_t, b1, w2_t, b2, *, block_b=512,
                       matmul_dtype=jnp.bfloat16):
    """x: (B, D) f32; w1_t: (D, H); b1: (1, H); w2_t: (H, C); b2: (1, C).

    Returns softmax(relu(x @ w1_t + b1) @ w2_t + b2, axis=1) with shape (B, C).
    """
    B, D = x.shape
    H = w1_t.shape[1]
    C = w2_t.shape[1]

    # --- Lane-dense class dimension (C=2 -> exactly one 128-lane group) ---
    c_pad = _round_up(C, _LANE)

    # --- Pre-cast weights once (no per-step casts in the kernel body) -----
    w1c = w1_t.astype(matmul_dtype)
    w2c = jnp.pad(w2_t, ((0, 0), (0, c_pad - C))).astype(matmul_dtype)
    b1c = b1.astype(jnp.float32)
    b2c = jnp.pad(b2, ((0, 0), (0, c_pad - C)),
                  constant_values=_NEG_BIG).astype(jnp.float32)

    # --- Batch tiling: no wrapper-side pad of x --------------------------
    tb = min(block_b, _round_up(B, _SUBLANE))
    # v7x megacore: keep >=2 grid steps when the batch is big enough to split.
    if tb >= B and B > 2 * _SUBLANE:
        tb = _round_up(-(-B // 2), _SUBLANE)
    grid = (pl.cdiv(B, tb),)

    # --- VMEM budget (generation-aware cap, no double counting) ----------
    dtb = jnp.dtype(matmul_dtype).itemsize
    f32 = 4
    resident = 2 * ((D * H + H * c_pad) * dtb + (H + c_pad) * f32)  # default 2-buf
    per_step = 2 * (tb * D + tb * c_pad) * f32                      # 2-buf x / out tiles
    live = tb * (H + c_pad) * f32                                   # h / logits values
    need = resident + per_step + live + (8 << 20)                   # headroom
    cap = int(0.75 * _vmem_capacity_bytes())                        # ~96 MiB v5e/v6e, ~48 MiB v7x
    vmem_limit = max(16 * 1024 * 1024, min(cap, need))

    cost = pl.CostEstimate(
        flops=2 * B * D * H + 2 * B * H * c_pad,
        transcendentals=B * c_pad,  # exp
        bytes_accessed=(x.size * f32 + w1c.size * dtb + b1c.size * f32
                        + w2c.size * dtb + b2c.size * f32 + B * c_pad * f32),
    )

    out = pl.pallas_call(
        _vit_kernel,
        out_shape=jax.ShapeDtypeStruct((B, c_pad), jnp.float32),
        grid=grid,
        in_specs=[
            pl.BlockSpec((tb, D), lambda i: (i, 0)),       # x: tiled over batch
            pl.BlockSpec((D, H), lambda i: (0, 0)),        # W1: VMEM-resident
            pl.BlockSpec((1, H), lambda i: (0, 0)),        # b1: resident
            pl.BlockSpec((H, c_pad), lambda i: (0, 0)),    # W2 (padded): resident
            pl.BlockSpec((1, c_pad), lambda i: (0, 0)),    # b2 (padded): resident
        ],
        out_specs=pl.BlockSpec((tb, c_pad), lambda i: (i, 0)),
        compiler_params=pltpu.CompilerParams(
            dimension_semantics=("parallel",),  # shard batch across TCs on v7x
            vmem_limit_bytes=int(vmem_limit),
        ),
        cost_estimate=cost,
    )(x, w1c, b1c, w2c, b2c)

    return out[:, :C]


def init_params(key, input_dim, hidden_dim, num_classes):
    """PyTorch-style nn.Linear init: U(-1/sqrt(fan_in), 1/sqrt(fan_in))."""
    k1, k2, k3, k4 = jax.random.split(key, 4)
    bound1 = 1.0 / jnp.sqrt(jnp.float32(input_dim))
    bound2 = 1.0 / jnp.sqrt(jnp.float32(hidden_dim))
    # Stored already transposed relative to torch's (out, in) convention.
    w1_t = jax.random.uniform(k1, (input_dim, hidden_dim), jnp.float32, -bound1, bound1)
    b1 = jax.random.uniform(k2, (1, hidden_dim), jnp.float32, -bound1, bound1)
    w2_t = jax.random.uniform(k3, (hidden_dim, num_classes), jnp.float32, -bound2, bound2)
    b2 = jax.random.uniform(k4, (1, num_classes), jnp.float32, -bound2, bound2)
    return w1_t, b1, w2_t, b2


def reference_forward(x, w1_t, b1, w2_t, b2):
    h = jnp.maximum(x @ w1_t + b1, 0.0)
    logits = h @ w2_t + b2
    return jax.nn.softmax(logits, axis=1)


if __name__ == "__main__":
    # Small shapes consistent with the module: hidden_dim=128, num_classes=2,
    # a small feature dim, batch=8.
    batch, input_dim, hidden_dim, num_classes = 8, 16, 128, 2

    key = jax.random.PRNGKey(0)
    kx, kp = jax.random.split(key)
    x = jax.random.normal(kx, (batch, input_dim), jnp.float32)
    w1_t, b1, w2_t, b2 = init_params(kp, input_dim, hidden_dim, num_classes)

    ref = reference_forward(x, w1_t, b1, w2_t, b2)

    # f32 matmul path: tight correctness check at toy shapes.
    out = simple_vit_forward(x, w1_t, b1, w2_t, b2, matmul_dtype=jnp.float32)
    out = jax.block_until_ready(out)
    assert out.shape == (batch, num_classes)
    assert jnp.allclose(out, ref, atol=1e-5, rtol=1e-5), "f32 mismatch vs reference"
    assert jnp.allclose(jnp.sum(out, axis=1), 1.0, atol=1e-5), "softmax rows must sum to 1"

    # bf16 matmul path (production default: native MXU path on v5e/v6e/v7x).
    out_bf16 = simple_vit_forward(x, w1_t, b1, w2_t, b2)
    out_bf16 = jax.block_until_ready(out_bf16)
    assert out_bf16.shape == (batch, num_classes)
    assert jnp.allclose(out_bf16, ref, atol=5e-2, rtol=5e-2), "bf16 mismatch vs reference"
    assert jnp.allclose(jnp.sum(out_bf16, axis=1), 1.0, atol=1e-5), "softmax rows must sum to 1"

    print("KERNEL_OK")
</pallas_src>

<mosaic_0001>
module attributes {stable_mosaic.version = 11 : i64} {
  func.func @_vit_kernel(%arg0: i32, %arg1: memref<8x16xf32, #tpu.memory_space<vmem>>, %arg2: memref<16x128xf32, #tpu.memory_space<vmem>>, %arg3: memref<1x128xf32, #tpu.memory_space<vmem>>, %arg4: memref<128x128xf32, #tpu.memory_space<vmem>>, %arg5: memref<1x128xf32, #tpu.memory_space<vmem>>, %arg6: memref<8x128xf32, #tpu.memory_space<vmem>>) attributes {dimension_semantics = [#tpu.dimension_semantics<parallel>], iteration_bounds = array<i64: 1>, scalar_prefetch = 0 : i64, scratch_operands = 0 : i64, tpu.core_type = #tpu.core_type<tc>, window_params = [{transform_indices = @transform_0, window_bounds = array<i64: 8, 16>}, {pipeline_mode = #tpu.pipeline_mode<synchronous>, transform_indices = @transform_1, window_bounds = array<i64: 16, 128>}, {pipeline_mode = #tpu.pipeline_mode<synchronous>, transform_indices = @transform_2, window_bounds = array<i64: 1, 128>}, {pipeline_mode = #tpu.pipeline_mode<synchronous>, transform_indices = @transform_3, window_bounds = array<i64: 128, 128>}, {pipeline_mode = #tpu.pipeline_mode<synchronous>, transform_indices = @transform_4, window_bounds = array<i64: 1, 128>}, {transform_indices = @transform_5, window_bounds = array<i64: 8, 128>}]} {
    %c0 = arith.constant 0 : index
    %c0_0 = arith.constant 0 : index
    %0 = vector.load %arg1[%c0, %c0_0] : memref<8x16xf32, #tpu.memory_space<vmem>>, vector<8x16xf32>
    %c0_1 = arith.constant 0 : index
    %c0_2 = arith.constant 0 : index
    %1 = vector.load %arg2[%c0_1, %c0_2] : memref<16x128xf32, #tpu.memory_space<vmem>>, vector<16x128xf32>
    %cst = arith.constant dense<0.000000e+00> : vector<8x128xf32>
    %2 = tpu.matmul %0, %1, %cst {dimension_numbers = #tpu.dot_dimension_numbers<[1], [0], [0], [1], [0, 0, 1, 1], [], []>} : vector<8x16xf32>, vector<16x128xf32>, vector<8x128xf32> -> vector<8x128xf32>
    %c0_3 = arith.constant 0 : index
    %c0_4 = arith.constant 0 : index
    %3 = vector.load %arg3[%c0_3, %c0_4] : memref<1x128xf32, #tpu.memory_space<vmem>>, vector<1x128xf32>
    %4 = vector.broadcast %3 : vector<1x128xf32> to vector<8x128xf32>
    %5 = arith.addf %2, %4 : vector<8x128xf32>
    %cst_5 = arith.constant 0.000000e+00 : f32
    %6 = vector.broadcast %cst_5 : f32 to vector<8x128xf32>
    %7 = arith.maximumf %5, %6 : vector<8x128xf32>
    %c0_6 = arith.constant 0 : index
    %c0_7 = arith.constant 0 : index
    %8 = vector.load %arg4[%c0_6, %c0_7] : memref<128x128xf32, #tpu.memory_space<vmem>>, vector<128x128xf32>
    %cst_8 = arith.constant dense<0.000000e+00> : vector<8x128xf32>
    %9 = tpu.matmul %7, %8, %cst_8 {dimension_numbers = #tpu.dot_dimension_numbers<[1], [0], [0], [1], [0, 0, 1, 1], [], []>} : vector<8x128xf32>, vector<128x128xf32>, vector<8x128xf32> -> vector<8x128xf32>
    %c0_9 = arith.constant 0 : index
    %c0_10 = arith.constant 0 : index
    %10 = vector.load %arg5[%c0_9, %c0_10] : memref<1x128xf32, #tpu.memory_space<vmem>>, vector<1x128xf32>
    %11 = vector.broadcast %10 : vector<1x128xf32> to vector<8x128xf32>
    %12 = arith.addf %9, %11 : vector<8x128xf32>
    %cst_11 = arith.constant dense<0xFF800000> : vector<8xf32>
    %13 = vector.multi_reduction <maximumf>, %12, %cst_11 [1] : vector<8x128xf32> to vector<8xf32>
    %14 = vector.shape_cast %13 : vector<8xf32> to vector<8x1xf32>
    %15 = vector.broadcast %14 : vector<8x1xf32> to vector<8x128xf32>
    %16 = arith.subf %12, %15 : vector<8x128xf32>
    %17 = math.exp %16 : vector<8x128xf32>
    %cst_12 = arith.constant dense<0.000000e+00> : vector<8xf32>
    %18 = vector.multi_reduction <add>, %17, %cst_12 [1] : vector<8x128xf32> to vector<8xf32>
    %19 = vector.shape_cast %18 : vector<8xf32> to vector<8x1xf32>
    %20 = vector.broadcast %19 : vector<8x1xf32> to vector<8x128xf32>
    %21 = arith.divf %17, %20 : vector<8x128xf32>
    %c0_13 = arith.constant 0 : index
    %c0_14 = arith.constant 0 : index
    %22 = vector.load %arg6[%c0_13, %c0_14] : memref<8x128xf32, #tpu.memory_space<vmem>>, vector<8x128xf32>
    tpu.vector_store %arg6[%c0_13, %c0_14], %21 {strides = array<i32>} : memref<8x128xf32, #tpu.memory_space<vmem>>, vector<8x128xf32>,
    return
  }
  func.func @transform_0(%arg0: i32) -> (i32, i32) {
    %c0_i32 = arith.constant 0 : i32
    %c0_i32_0 = arith.constant 0 : i32
    return %arg0, %c0_i32 : i32, i32
  }
  func.func @transform_1(%arg0: i32) -> (i32, i32) {
    %c0_i32 = arith.constant 0 : i32
    %c0_i32_0 = arith.constant 0 : i32
    %c0_i32_1 = arith.constant 0 : i32
    return %c0_i32, %c0_i32_0 : i32, i32
  }
  func.func @transform_2(%arg0: i32) -> (i32, i32) {
    %c0_i32 = arith.constant 0 : i32
    %c0_i32_0 = arith.constant 0 : i32
    %c0_i32_1 = arith.constant 0 : i32
    return %c0_i32, %c0_i32_0 : i32, i32
  }
  func.func @transform_3(%arg0: i32) -> (i32, i32) {
    %c0_i32 = arith.constant 0 : i32
    %c0_i32_0 = arith.constant 0 : i32
    %c0_i32_1 = arith.constant 0 : i32
    return %c0_i32, %c0_i32_0 : i32, i32
  }
  func.func @transform_4(%arg0: i32) -> (i32, i32) {
    %c0_i32 = arith.constant 0 : i32
    %c0_i32_0 = arith.constant 0 : i32
    %c0_i32_1 = arith.constant 0 : i32
    return %c0_i32, %c0_i32_0 : i32, i32
  }
  func.func @transform_5(%arg0: i32) -> (i32, i32) {
    %c0_i32 = arith.constant 0 : i32
    %c0_i32_0 = arith.constant 0 : i32
    return %arg0, %c0_i32 : i32, i32
  }
}

</mosaic_0001>

<bundles_post_ra>
// kernel: simple_vit_forward.1
= control target key start
LH: loop header
LB: loop body
LE: loop exit
PB: predicated region body
PF: predicated region fallthrough
CT: control target
= control target key end

     0   :  { %vm27_vm0 = vcmask 130048   ;;  %s222_s1 = inlined_call_operand.vmem [shape: f32[16,128], index: 1, kind: input, shape index: {}]   ;;  %s223_s0 = inlined_call_operand.vmem [shape: f32[8,16], index: 0, kind: input, shape index: {}]   ;;  %s224_s3 = inlined_call_operand.vmem [shape: f32[128,128], index: 3, kind: input, shape index: {}]   ;;  %s225_s2 = inlined_call_operand.vmem [shape: f32[1,128], index: 2, kind: input, shape index: {}]   ;;  %s226_s4 = inlined_call_operand.vmem [shape: f32[1,128], index: 4, kind: input, shape index: {}]   ;;  %s227_s5 = inlined_call_operand.vmem [shape: f32[8,128], index: 5, kind: output, shape index: {}]  }
   0x1   :  { %v22_v0 = vld [vmem:[%s222_s1 + $0x8] sm:$0xff]  ;;  %v21_v1 = vld [vmem:[%s222_s1] sm:$0xff]  ;;  %v67_v3 = vld [vmem:[%s224_s3 + $0x78] sm:$0xff] }
   0x2   :  { %45 = vmatpush.msra.mxu0 %v22_v0  ;;  %v20_v2 = vld [vmem:[%s223_s0] sm:$0xff]  ;;  %v66_v4 = vld [vmem:[%s224_s3 + $0x70] sm:$0xff]  ;;  %72 = vmatpush.msra.mxu1 %v67_v3  ;;  %v65_v5 = vld [vmem:[%s224_s3 + $0x68] sm:$0xff] }
   0x3   :  { %v64_v6 = vld [vmem:[%s224_s3 + $0x60] sm:$0xff]  ;;  %v63_v7 = vld [vmem:[%s224_s3 + $0x58] sm:$0xff]  ;;  %v62_v8 = vld [vmem:[%s224_s3 + $0x50] sm:$0xff] }
   0x4   :  { %46 = vmatpush.msra.mxu0 %v21_v1  ;;  %73 = vmatpush.msra.mxu1 %v66_v4  ;;  %v61_v9 = vld [vmem:[%s224_s3 + $0x48] sm:$0xff]  ;;  %v60_v10 = vld [vmem:[%s224_s3 + $0x40] sm:$0xff]  ;;  %v59_v11 = vld [vmem:[%s224_s3 + $0x38] sm:$0xff] }
   0x5   :  { %119 = vmatmul.msk.f32.vlgmr.msra.gmra.mxu0 %vm27_vm0, %v20_v2  ;;  %v58_v12 = vld [vmem:[%s224_s3 + $0x30] sm:$0xff]  ;;  %v57_v13 = vld [vmem:[%s224_s3 + $0x28] sm:$0xff]  ;;  %v56_v14 = vld [vmem:[%s224_s3 + $0x20] sm:$0xff] }
   0x6   :  { %74 = vmatpush.msra.mxu1 %v65_v5  ;;  %v55_v15 = vld [vmem:[%s224_s3 + $0x18] sm:$0xff]  ;;  %v54_v16 = vld [vmem:[%s224_s3 + $0x10] sm:$0xff]  ;;  %v53_v17 = vld [vmem:[%s224_s3 + $0x8] sm:$0xff] }
   0x7   :  { %v52_v18 = vld [vmem:[%s224_s3] sm:$0xff] }
   0x8   :  { %75 = vmatpush.msra.mxu1 %v64_v6  ;;  %v120_v19 = vld [vmem:[%s225_s2] ss:$0 sm:$0xff] }
   0x9   :  { %v121_v23 = vld [vmem:[%s226_s4] ss:$0 sm:$0xff] }
   0xa   :  { %76 = vmatpush.msra.mxu1 %v63_v7 }
   0xc   :  { %77 = vmatpush.msra.mxu1 %v62_v8 }
   0xe   :  { %78 = vmatpush.msra.mxu1 %v61_v9 }
  0x10   :  { %79 = vmatpush.msra.mxu1 %v60_v10 }
  0x12   :  { %80 = vmatpush.msra.mxu1 %v59_v11 }
  0x14   :  { %81 = vmatpush.msra.mxu1 %v58_v12 }
  0x16   :  { %82 = vmatpush.msra.mxu1 %v57_v13 }
  0x18   :  { %83 = vmatpush.msra.mxu1 %v56_v14 }
  0x1a   :  { %84 = vmatpush.msra.mxu1 %v55_v15 }
  0x1c   :  { %85 = vmatpush.msra.mxu1 %v54_v16 }
  0x1e   :  { %86 = vmatpush.msra.mxu1 %v53_v17 }
  0x20   :  { %87 = vmatpush.msra.mxu1 %v52_v18 }
  0x82   :  { %v48_v20 = vpop.f32.mrf.mxu0 }
  0x83   :  { %v49_v21 = vadd.f32 %v120_v19, %v48_v20 }
  0x85   :  { %v51_v22 = vmax.f32 %v49_v21, 0.0 }
  0x87   :  { %88 = vmatmul.f32.vlgmr.msra.gmra.mxu1 %v51_v22 }
 0x104   :  { %v89_v24 = vpop.f32.mrf.mxu1 }
 0x105   :  { %v90_v25 = vadd.f32 %v121_v23, %v89_v24 }
 0x107   :  { %92 = vmax.xlane.f32.xlu0 %v90_v25 }
 0x17a   :  { %v93_v26 = vpop.xlane.xlu0 %92 }
 0x17b   :  { %v94_v27 = vsub.f32 %v90_v25, %v93_v26 }
 0x17d   :  { %v95_v28 = vmul.f32 1.442695, %v94_v27 }
 0x17f   :  { %122 = vpow2.f32 %v95_v28 }
 0x185   :  { %v123_v29 = vpop.eup %122 }
 0x186   :  { %97 = vadd.xlane.f32.xlu0 %v123_v29 }
 0x1f9   :  { %v98_v30 = vpop.xlane.xlu0 %97 }
 0x1fa   :  { %124 = vrcp.f32 %v98_v30  ;;  %v110_v34 = vand.u32 2147483648, %v98_v30  ;;  %v108_v36 = vand.u32 2147483647, %v98_v30  ;;  %vm104_vm2 = vweird.f32 %v98_v30 }
 0x1fc   :  { %v111_v38 = vor.u32 1.1754944e-38, %v110_v34  ;;  %vm109_vm4 = vcmp.eq.f32.partialorder %v108_v36, 8.507059e+37 }
 0x200   :  { %v125_v31 = vpop.eup %124 }
 0x201   :  { %v100_v32 = vmul.f32 %v125_v31, %v98_v30  ;;  %vm105_vm1 = vweird.f32 %v125_v31 }
 0x202   :  { %vm106_vm3 = vmor %vm104_vm2, %vm105_vm1 }
 0x203   :  { %v101_v33 = vsub.f32 1.0, %v100_v32 }
 0x205   :  { %v102_v35 = vmul.f32 %v125_v31, %v101_v33 }
 0x207   :  { %v103_v37 = vadd.f32 %v125_v31, %v102_v35 }
 0x209   :  { %v107_v39 = vsel %vm106_vm3, %v125_v31, %v103_v37 }
 0x20a   :  { %v112_v40 = vsel %vm109_vm4, %v111_v38, %v107_v39 }
 0x20b   :  { %v113_v41 = vmul.f32 %v123_v29, %v112_v40 }
 0x20d   :  { %114 = vst [vmem:[%s227_s5] sm:$0xff] %v113_v41 }

</bundles_post_ra>
